<compile_context>
chip_gen: v7x
topology: tpu7x:2x2x1
jax: 0.10.0
libtpu: 0.0.40
codegen_flags: <defaults>
</compile_context>

<pallas_src>
import jax
import jax.numpy as jnp
from jax import lax
from jax.experimental import pallas as pl
from jax.experimental.pallas import tpu as pltpu

HIDDEN = 128
INPUT_SIZE = 1


def _rnn_seq_kernel(inp_ref, w_hh_t_ref, out_ref, hn_ref):
    """Whole-sequence Elman RNN recurrence in one grid step.

    inp_ref:   (seq_len*batch, HIDDEN)  precomputed x @ W_ih^T + b_ih + b_hh
    w_hh_t_ref:(HIDDEN, HIDDEN)         W_hh^T
    out_ref:   (seq_len*batch, HIDDEN)  all hidden states, lane-dense slab
    hn_ref:    (batch, HIDDEN)          final hidden state

        h_t = tanh(inp_t + h_{t-1} @ W_hh^T)
    """
    batch = hn_ref.shape[0]
    seq_len = out_ref.shape[0] // batch

    w_hh_t = w_hh_t_ref[...]                       # resident for the whole loop
    h0 = jnp.zeros((batch, HIDDEN), jnp.float32)   # init_hidden: zeros

    def step(t, h_prev):
        inp_t = inp_ref[pl.ds(t * batch, batch), :]
        rec = jnp.dot(h_prev, w_hh_t, preferred_element_type=jnp.float32)
        h_new = jnp.tanh(inp_t + rec)
        out_ref[pl.ds(t * batch, batch), :] = h_new.astype(out_ref.dtype)
        return h_new

    # Fully unrolled: static trip count, lets the scheduler hide stores/loads
    # under each step's matmul + tanh latency.
    h_final = lax.fori_loop(0, seq_len, step, h0, unroll=True)
    hn_ref[...] = h_final.astype(hn_ref.dtype)


def rnn_forward(x, w_ih, w_hh, b_ih, b_hh):
    """x: (seq_len, batch, 1) float32.  Returns (output, h_n) like nn.RNN."""
    seq_len, batch, input_size = x.shape
    assert input_size == INPUT_SIZE

    # Hoist the input projection out of the serial chain: one lane-dense
    # (seq_len*batch, HIDDEN) buffer computed by plain XLA.
    x_flat = x.reshape(seq_len * batch, input_size).astype(jnp.float32)
    inp = x_flat @ w_ih.T + (b_ih + b_hh)          # (T*B, H)
    w_hh_t = jnp.transpose(w_hh)                    # (H, H)

    out_flat, h_n = pl.pallas_call(
        _rnn_seq_kernel,
        out_shape=(
            jax.ShapeDtypeStruct((seq_len * batch, HIDDEN), jnp.float32),
            jax.ShapeDtypeStruct((batch, HIDDEN), jnp.float32),
        ),
        grid=(1,),
        in_specs=[
            pl.BlockSpec((seq_len * batch, HIDDEN), lambda i: (0, 0)),
            pl.BlockSpec((HIDDEN, HIDDEN), lambda i: (0, 0)),
        ],
        out_specs=(
            pl.BlockSpec((seq_len * batch, HIDDEN), lambda i: (0, 0)),
            pl.BlockSpec((batch, HIDDEN), lambda i: (0, 0)),
        ),
        compiler_params=pltpu.CompilerParams(
            dimension_semantics=("arbitrary",)),  # recurrence is sequential
    )(inp, w_hh_t)

    return out_flat.reshape(seq_len, batch, HIDDEN), h_n[None]


def _rnn_reference(x, w_ih, w_hh, b_ih, b_hh):
    """Pure-JAX reference (matches torch.nn.RNN forward with h0 = zeros)."""
    batch = x.shape[1]
    h0 = jnp.zeros((batch, HIDDEN), jnp.float32)

    def step(h, x_t):
        h_new = jnp.tanh(x_t @ w_ih.T + b_ih + h @ w_hh.T + b_hh)
        return h_new, h_new

    h_n, outs = jax.lax.scan(step, h0, x)
    return outs, h_n[None]


if __name__ == "__main__":
    seq_len, batch = 8, 2

    key = jax.random.PRNGKey(0)
    k_x, k_wih, k_whh, k_bih, k_bhh = jax.random.split(key, 5)

    # PyTorch default init: U(-1/sqrt(hidden), 1/sqrt(hidden))
    bound = 1.0 / jnp.sqrt(jnp.float32(HIDDEN))
    w_ih = jax.random.uniform(k_wih, (HIDDEN, INPUT_SIZE), jnp.float32, -bound, bound)
    w_hh = jax.random.uniform(k_whh, (HIDDEN, HIDDEN), jnp.float32, -bound, bound)
    b_ih = jax.random.uniform(k_bih, (HIDDEN,), jnp.float32, -bound, bound)
    b_hh = jax.random.uniform(k_bhh, (HIDDEN,), jnp.float32, -bound, bound)

    x = jax.random.normal(k_x, (seq_len, batch, INPUT_SIZE), jnp.float32)

    out, h_n = rnn_forward(x, w_ih, w_hh, b_ih, b_hh)
    out = jax.block_until_ready(out)
    h_n = jax.block_until_ready(h_n)

    ref_out, ref_hn = _rnn_reference(x, w_ih, w_hh, b_ih, b_hh)
    assert out.shape == (seq_len, batch, HIDDEN)
    assert h_n.shape == (1, batch, HIDDEN)
    assert jnp.allclose(out, ref_out, atol=1e-5, rtol=1e-5)
    assert jnp.allclose(h_n, ref_hn, atol=1e-5, rtol=1e-5)

    print("KERNEL_OK")
</pallas_src>

<mosaic_0001>
module attributes {stable_mosaic.version = 11 : i64} {
  func.func @_rnn_seq_kernel(%arg0: i32, %arg1: memref<16x128xf32, #tpu.memory_space<vmem>>, %arg2: memref<128x128xf32, #tpu.memory_space<vmem>>, %arg3: memref<16x128xf32, #tpu.memory_space<vmem>>, %arg4: memref<2x128xf32, #tpu.memory_space<vmem>>) attributes {dimension_semantics = [#tpu.dimension_semantics<arbitrary>], iteration_bounds = array<i64: 1>, scalar_prefetch = 0 : i64, scratch_operands = 0 : i64, tpu.core_type = #tpu.core_type<tc>, window_params = [{pipeline_mode = #tpu.pipeline_mode<synchronous>, transform_indices = @transform_0, window_bounds = array<i64: 16, 128>}, {pipeline_mode = #tpu.pipeline_mode<synchronous>, transform_indices = @transform_1, window_bounds = array<i64: 128, 128>}, {pipeline_mode = #tpu.pipeline_mode<synchronous>, transform_indices = @transform_2, window_bounds = array<i64: 16, 128>}, {pipeline_mode = #tpu.pipeline_mode<synchronous>, transform_indices = @transform_3, window_bounds = array<i64: 2, 128>}]} {
    %c0 = arith.constant 0 : index
    %c0_0 = arith.constant 0 : index
    %0 = vector.load %arg2[%c0, %c0_0] : memref<128x128xf32, #tpu.memory_space<vmem>>, vector<128x128xf32>
    %cst = arith.constant 0.000000e+00 : f32
    %1 = vector.broadcast %cst : f32 to vector<2x128xf32>
    %c0_i32 = arith.constant 0 : i32
    %c2_i32 = arith.constant 2 : i32
    %2 = arith.muli %c0_i32, %c2_i32 : i32
    %3 = arith.index_cast %2 : i32 to index
    %c0_1 = arith.constant 0 : index
    %4 = vector.load %arg1[%3, %c0_1] : memref<16x128xf32, #tpu.memory_space<vmem>>, vector<2x128xf32>
    %cst_2 = arith.constant dense<0.000000e+00> : vector<2x128xf32>
    %5 = tpu.matmul %1, %0, %cst_2 {dimension_numbers = #tpu.dot_dimension_numbers<[1], [0], [0], [1], [0, 0, 1, 1], [], []>} : vector<2x128xf32>, vector<128x128xf32>, vector<2x128xf32> -> vector<2x128xf32>
    %6 = arith.addf %4, %5 : vector<2x128xf32>
    %7 = math.tanh %6 : vector<2x128xf32>
    %c2_i32_3 = arith.constant 2 : i32
    %8 = arith.muli %c0_i32, %c2_i32_3 : i32
    %9 = arith.index_cast %8 : i32 to index
    %c0_4 = arith.constant 0 : index
    %10 = vector.load %arg3[%9, %c0_4] : memref<16x128xf32, #tpu.memory_space<vmem>>, vector<2x128xf32>
    tpu.vector_store %arg3[%9, %c0_4], %7 {strides = array<i32>} : memref<16x128xf32, #tpu.memory_space<vmem>>, vector<2x128xf32>,
    %c1_i32 = arith.constant 1 : i32
    %c2_i32_5 = arith.constant 2 : i32
    %11 = arith.muli %c1_i32, %c2_i32_5 : i32
    %12 = arith.index_cast %11 : i32 to index
    %c0_6 = arith.constant 0 : index
    %13 = vector.load %arg1[%12, %c0_6] : memref<16x128xf32, #tpu.memory_space<vmem>>, vector<2x128xf32>
    %cst_7 = arith.constant dense<0.000000e+00> : vector<2x128xf32>
    %14 = tpu.matmul %7, %0, %cst_7 {dimension_numbers = #tpu.dot_dimension_numbers<[1], [0], [0], [1], [0, 0, 1, 1], [], []>} : vector<2x128xf32>, vector<128x128xf32>, vector<2x128xf32> -> vector<2x128xf32>
    %15 = arith.addf %13, %14 : vector<2x128xf32>
    %16 = math.tanh %15 : vector<2x128xf32>
    %c2_i32_8 = arith.constant 2 : i32
    %17 = arith.muli %c1_i32, %c2_i32_8 : i32
    %18 = arith.index_cast %17 : i32 to index
    %c0_9 = arith.constant 0 : index
    %19 = vector.load %arg3[%18, %c0_9] : memref<16x128xf32, #tpu.memory_space<vmem>>, vector<2x128xf32>
    tpu.vector_store %arg3[%18, %c0_9], %16 {strides = array<i32>} : memref<16x128xf32, #tpu.memory_space<vmem>>, vector<2x128xf32>,
    %c2_i32_10 = arith.constant 2 : i32
    %c2_i32_11 = arith.constant 2 : i32
    %20 = arith.muli %c2_i32_10, %c2_i32_11 : i32
    %21 = arith.index_cast %20 : i32 to index
    %c0_12 = arith.constant 0 : index
    %22 = vector.load %arg1[%21, %c0_12] : memref<16x128xf32, #tpu.memory_space<vmem>>, vector<2x128xf32>
    %cst_13 = arith.constant dense<0.000000e+00> : vector<2x128xf32>
    %23 = tpu.matmul %16, %0, %cst_13 {dimension_numbers = #tpu.dot_dimension_numbers<[1], [0], [0], [1], [0, 0, 1, 1], [], []>} : vector<2x128xf32>, vector<128x128xf32>, vector<2x128xf32> -> vector<2x128xf32>
    %24 = arith.addf %22, %23 : vector<2x128xf32>
    %25 = math.tanh %24 : vector<2x128xf32>
    %c2_i32_14 = arith.constant 2 : i32
    %26 = arith.muli %c2_i32_10, %c2_i32_14 : i32
    %27 = arith.index_cast %26 : i32 to index
    %c0_15 = arith.constant 0 : index
    %28 = vector.load %arg3[%27, %c0_15] : memref<16x128xf32, #tpu.memory_space<vmem>>, vector<2x128xf32>
    tpu.vector_store %arg3[%27, %c0_15], %25 {strides = array<i32>} : memref<16x128xf32, #tpu.memory_space<vmem>>, vector<2x128xf32>,
    %c3_i32 = arith.constant 3 : i32
    %c2_i32_16 = arith.constant 2 : i32
    %29 = arith.muli %c3_i32, %c2_i32_16 : i32
    %30 = arith.index_cast %29 : i32 to index
    %c0_17 = arith.constant 0 : index
    %31 = vector.load %arg1[%30, %c0_17] : memref<16x128xf32, #tpu.memory_space<vmem>>, vector<2x128xf32>
    %cst_18 = arith.constant dense<0.000000e+00> : vector<2x128xf32>
    %32 = tpu.matmul %25, %0, %cst_18 {dimension_numbers = #tpu.dot_dimension_numbers<[1], [0], [0], [1], [0, 0, 1, 1], [], []>} : vector<2x128xf32>, vector<128x128xf32>, vector<2x128xf32> -> vector<2x128xf32>
    %33 = arith.addf %31, %32 : vector<2x128xf32>
    %34 = math.tanh %33 : vector<2x128xf32>
    %c2_i32_19 = arith.constant 2 : i32
    %35 = arith.muli %c3_i32, %c2_i32_19 : i32
    %36 = arith.index_cast %35 : i32 to index
    %c0_20 = arith.constant 0 : index
    %37 = vector.load %arg3[%36, %c0_20] : memref<16x128xf32, #tpu.memory_space<vmem>>, vector<2x128xf32>
    tpu.vector_store %arg3[%36, %c0_20], %34 {strides = array<i32>} : memref<16x128xf32, #tpu.memory_space<vmem>>, vector<2x128xf32>,
    %c4_i32 = arith.constant 4 : i32
    %c2_i32_21 = arith.constant 2 : i32
    %38 = arith.muli %c4_i32, %c2_i32_21 : i32
    %39 = arith.index_cast %38 : i32 to index
    %c0_22 = arith.constant 0 : index
    %40 = vector.load %arg1[%39, %c0_22] : memref<16x128xf32, #tpu.memory_space<vmem>>, vector<2x128xf32>
    %cst_23 = arith.constant dense<0.000000e+00> : vector<2x128xf32>
    %41 = tpu.matmul %34, %0, %cst_23 {dimension_numbers = #tpu.dot_dimension_numbers<[1], [0], [0], [1], [0, 0, 1, 1], [], []>} : vector<2x128xf32>, vector<128x128xf32>, vector<2x128xf32> -> vector<2x128xf32>
    %42 = arith.addf %40, %41 : vector<2x128xf32>
    %43 = math.tanh %42 : vector<2x128xf32>
    %c2_i32_24 = arith.constant 2 : i32
    %44 = arith.muli %c4_i32, %c2_i32_24 : i32
    %45 = arith.index_cast %44 : i32 to index
    %c0_25 = arith.constant 0 : index
    %46 = vector.load %arg3[%45, %c0_25] : memref<16x128xf32, #tpu.memory_space<vmem>>, vector<2x128xf32>
    tpu.vector_store %arg3[%45, %c0_25], %43 {strides = array<i32>} : memref<16x128xf32, #tpu.memory_space<vmem>>, vector<2x128xf32>,
    %c5_i32 = arith.constant 5 : i32
    %c2_i32_26 = arith.constant 2 : i32
    %47 = arith.muli %c5_i32, %c2_i32_26 : i32
    %48 = arith.index_cast %47 : i32 to index
    %c0_27 = arith.constant 0 : index
    %49 = vector.load %arg1[%48, %c0_27] : memref<16x128xf32, #tpu.memory_space<vmem>>, vector<2x128xf32>
    %cst_28 = arith.constant dense<0.000000e+00> : vector<2x128xf32>
    %50 = tpu.matmul %43, %0, %cst_28 {dimension_numbers = #tpu.dot_dimension_numbers<[1], [0], [0], [1], [0, 0, 1, 1], [], []>} : vector<2x128xf32>, vector<128x128xf32>, vector<2x128xf32> -> vector<2x128xf32>
    %51 = arith.addf %49, %50 : vector<2x128xf32>
    %52 = math.tanh %51 : vector<2x128xf32>
    %c2_i32_29 = arith.constant 2 : i32
    %53 = arith.muli %c5_i32, %c2_i32_29 : i32
    %54 = arith.index_cast %53 : i32 to index
    %c0_30 = arith.constant 0 : index
    %55 = vector.load %arg3[%54, %c0_30] : memref<16x128xf32, #tpu.memory_space<vmem>>, vector<2x128xf32>
    tpu.vector_store %arg3[%54, %c0_30], %52 {strides = array<i32>} : memref<16x128xf32, #tpu.memory_space<vmem>>, vector<2x128xf32>,
    %c6_i32 = arith.constant 6 : i32
    %c2_i32_31 = arith.constant 2 : i32
    %56 = arith.muli %c6_i32, %c2_i32_31 : i32
    %57 = arith.index_cast %56 : i32 to index
    %c0_32 = arith.constant 0 : index
    %58 = vector.load %arg1[%57, %c0_32] : memref<16x128xf32, #tpu.memory_space<vmem>>, vector<2x128xf32>
    %cst_33 = arith.constant dense<0.000000e+00> : vector<2x128xf32>
    %59 = tpu.matmul %52, %0, %cst_33 {dimension_numbers = #tpu.dot_dimension_numbers<[1], [0], [0], [1], [0, 0, 1, 1], [], []>} : vector<2x128xf32>, vector<128x128xf32>, vector<2x128xf32> -> vector<2x128xf32>
    %60 = arith.addf %58, %59 : vector<2x128xf32>
    %61 = math.tanh %60 : vector<2x128xf32>
    %c2_i32_34 = arith.constant 2 : i32
    %62 = arith.muli %c6_i32, %c2_i32_34 : i32
    %63 = arith.index_cast %62 : i32 to index
    %c0_35 = arith.constant 0 : index
    %64 = vector.load %arg3[%63, %c0_35] : memref<16x128xf32, #tpu.memory_space<vmem>>, vector<2x128xf32>
    tpu.vector_store %arg3[%63, %c0_35], %61 {strides = array<i32>} : memref<16x128xf32, #tpu.memory_space<vmem>>, vector<2x128xf32>,
    %c7_i32 = arith.constant 7 : i32
    %c2_i32_36 = arith.constant 2 : i32
    %65 = arith.muli %c7_i32, %c2_i32_36 : i32
    %66 = arith.index_cast %65 : i32 to index
    %c0_37 = arith.constant 0 : index
    %67 = vector.load %arg1[%66, %c0_37] : memref<16x128xf32, #tpu.memory_space<vmem>>, vector<2x128xf32>
    %cst_38 = arith.constant dense<0.000000e+00> : vector<2x128xf32>
    %68 = tpu.matmul %61, %0, %cst_38 {dimension_numbers = #tpu.dot_dimension_numbers<[1], [0], [0], [1], [0, 0, 1, 1], [], []>} : vector<2x128xf32>, vector<128x128xf32>, vector<2x128xf32> -> vector<2x128xf32>
    %69 = arith.addf %67, %68 : vector<2x128xf32>
    %70 = math.tanh %69 : vector<2x128xf32>
    %c2_i32_39 = arith.constant 2 : i32
    %71 = arith.muli %c7_i32, %c2_i32_39 : i32
    %72 = arith.index_cast %71 : i32 to index
    %c0_40 = arith.constant 0 : index
    %73 = vector.load %arg3[%72, %c0_40] : memref<16x128xf32, #tpu.memory_space<vmem>>, vector<2x128xf32>
    tpu.vector_store %arg3[%72, %c0_40], %70 {strides = array<i32>} : memref<16x128xf32, #tpu.memory_space<vmem>>, vector<2x128xf32>,
    %c8_i32 = arith.constant 8 : i32
    %c0_41 = arith.constant 0 : index
    %c0_42 = arith.constant 0 : index
    %74 = vector.load %arg4[%c0_41, %c0_42] : memref<2x128xf32, #tpu.memory_space<vmem>>, vector<2x128xf32>
    tpu.vector_store %arg4[%c0_41, %c0_42], %70 {strides = array<i32>} : memref<2x128xf32, #tpu.memory_space<vmem>>, vector<2x128xf32>,
    return
  }
  func.func @transform_0(%arg0: i32) -> (i32, i32) {
    %c0_i32 = arith.constant 0 : i32
    %c0_i32_0 = arith.constant 0 : i32
    %c0_i32_1 = arith.constant 0 : i32
    return %c0_i32, %c0_i32_0 : i32, i32
  }
  func.func @transform_1(%arg0: i32) -> (i32, i32) {
    %c0_i32 = arith.constant 0 : i32
    %c0_i32_0 = arith.constant 0 : i32
    %c0_i32_1 = arith.constant 0 : i32
    return %c0_i32, %c0_i32_0 : i32, i32
  }
  func.func @transform_2(%arg0: i32) -> (i32, i32) {
    %c0_i32 = arith.constant 0 : i32
    %c0_i32_0 = arith.constant 0 : i32
    %c0_i32_1 = arith.constant 0 : i32
    return %c0_i32, %c0_i32_0 : i32, i32
  }
  func.func @transform_3(%arg0: i32) -> (i32, i32) {
    %c0_i32 = arith.constant 0 : i32
    %c0_i32_0 = arith.constant 0 : i32
    %c0_i32_1 = arith.constant 0 : i32
    return %c0_i32, %c0_i32_0 : i32, i32
  }
}

</mosaic_0001>

<bundles_post_ra>
// kernel: tpu_custom_call.1
= control target key start
LH: loop header
LB: loop body
LE: loop exit
PB: predicated region body
PF: predicated region fallthrough
CT: control target
= control target key end

     0   :  { %9 = vsyncpa [#allocation3], 0  ;;  %s1660_s0 = inlined_call_operand.hbm [shape: f32[16,128], index: 0, kind: input, shape index: {}]   ;;  %s1661_s1 = inlined_call_operand.hbm [shape: f32[128,128], index: 1, kind: input, shape index: {}]   ;;  %s1662_s2 = inlined_call_operand.hbm [shape: f32[16,128], index: 2, kind: output, shape index: {0}]   ;;  %s1663_s3 = inlined_call_operand.hbm [shape: f32[2,128], index: 3, kind: output, shape index: {1}]  }
   0x1   :  { %10 = vsyncpa [#allocation6], 0 }
   0x2   :  { %11 = vsyncpa [#allocation4], 0 }
   0x3   :  { %12 = vsyncpa [#allocation9], 0  ;;  %s1413_s12 = smov [#allocation2]   ;;  %s1317_s16 = scalar_lea.hbm %s1660_s0, 256 }
   0x4   :  { %s18_s13 = sshll.u32 %s1413_s12, 4  ;;  %p1318_p0 = scmp.ne.s32.totalorder %s1660_s0, %s1317_s16  ;;  %s19_s13 = int_to_ptr.vmem [resolvable:$true] %s18_s13 }
   0x5   :  { %p1321_p1 = scmp.lt.u32.totalorder %s1317_s16, %s1660_s0 }
   0x7   :  { %p1323_p2 = pnand %p1321_p1, %p1318_p0 }
   0x9   :  { %1326 = shalt.err (!%p1323_p2)
}
   0xa   :  { %s1327_s21 = scalar_lea.vmem %s19_s13, 256  ;;  %p1332_p4 = scmp.lt.s32.totalorder %s19_s13, %s19_s13 }
   0xb   :  { %p1328_p3 = scmp.ne.s32.totalorder %s19_s13, %s1327_s21  ;;  %p1333_p5 = scmp.lt.s32.totalorder %s1327_s21, %s1327_s21 }
   0xd   :  { %p1334_p6 = por %p1333_p5, %p1332_p4 }
   0xf   :  { %p1335_p7 = pnand %p1334_p6, %p1328_p3 }
  0x11   :  { %1338 = shalt.err (!%p1335_p7)
}
  0x12   :  { %s1414_s22 = smov 128   ;;  %s1415_s23 = smov 8  }
  0x13   :  { %24 = dma.hbm_to_vmem [thread:$0]  %s1660_s0, 256, %s19_s13, [#allocation3], %s1414_s22, %s1414_s22, %s1415_s23  }
  0x14   :  { %s1416_s26 = smov [#allocation5]   ;;  %s1339_s30 = scalar_lea.hbm %s1661_s1, 2048 }
  0x15   :  { %s30_s27 = sshll.u32 %s1416_s26, 4  ;;  %p1340_p8 = scmp.ne.s32.totalorder %s1661_s1, %s1339_s30  ;;  %s31_s27 = int_to_ptr.vmem [resolvable:$true] %s30_s27 }
  0x16   :  { %p1343_p9 = scmp.lt.u32.totalorder %s1339_s30, %s1661_s1 }
  0x18   :  { %p1345_p10 = pnand %p1343_p9, %p1340_p8 }
  0x1a   :  { %1348 = shalt.err (!%p1345_p10)
}
  0x1b   :  { %s1349_s8 = scalar_lea.vmem %s31_s27, 2048  ;;  %p1354_p12 = scmp.lt.s32.totalorder %s31_s27, %s31_s27 }
  0x1c   :  { %p1350_p11 = scmp.ne.s32.totalorder %s31_s27, %s1349_s8  ;;  %p1355_p13 = scmp.lt.s32.totalorder %s1349_s8, %s1349_s8 }
  0x1e   :  { %p1356_p0 = por %p1355_p13, %p1354_p12 }
  0x20   :  { %p1357_p1 = pnand %p1356_p0, %p1350_p11 }
  0x22   :  { %1360 = shalt.err (!%p1357_p1)
}
  0x23   :  { %36 = dma.hbm_to_vmem [thread:$0]  %s1661_s1, 2048, %s31_s27, [#allocation6], %s1414_s22, %s1414_s22, %s1415_s23  }
  0x24   :  { %1405 = dma.done.wait [#allocation3], 256  }
  0x25   :  { %1406 = vsyncadd [#allocation3], 4294967040 }
  0x26   :  { %1407 = dma.done.wait [#allocation6], 2048  }
  0x27   :  { %1408 = vsyncadd [#allocation6], 4294965248  ;;  %v1417_v0 = vmov 0.0|0.0   ;;  %vm1418_vm0 = vmmov 0   ;;  %v1419_v1 = vmov 0.0   ;;  %v43_v2 = vld [vmem:[#allocation5] sm:$0xff] }
  0x28   :  { %1100 = vmatprep.subr.bf16.mxu0 %v1417_v0  ;;  %852 = vmatprep.mubr.msk.f32.mxu0 %vm1418_vm0, %v1419_v1  ;;  %v44_v3 = vld [vmem:[#allocation5 + $0x8] sm:$0xff]  ;;  %v45_v4 = vld [vmem:[#allocation5 + $0x10] sm:$0xff]  ;;  %v46_v6 = vld [vmem:[#allocation5 + $0x18] sm:$0xff]  ;;  %s1420_s1 = smov [#allocation7]   ;;  %s1421_s11 = smov [#allocation8]  }
  0x29   :  { %1124 = vmatprep.subr.bf16.mxu1 %v1417_v0  ;;  %887 = vmatprep.mubr.msk.f32.mxu1 %vm1418_vm0, %v1419_v1  ;;  %v1478_v5 = vpack.c.bf16 %v44_v3, %v43_v2  ;;  %v1481_v7 = vpack.c.bf16 %v46_v6, %v45_v4  ;;  %v47_v8 = vld [vmem:[#allocation5 + $0x20] sm:$0xff]  ;;  %v48_v9 = vld [vmem:[#allocation5 + $0x28] sm:$0xff]  ;;  %v49_v11 = vld [vmem:[#allocation5 + $0x30] sm:$0xff]  ;;  %s657_s10 = sshll.u32 %s1420_s1, 4  ;;  %s670_s12 = sshll.u32 %s1421_s11, 4  ;;  %s658_s10 = int_to_ptr.vmem [resolvable:$true] %s657_s10  ;;  %s671_s12 = int_to_ptr.vmem [resolvable:$true] %s670_s12 }
  0x2a   :  { %v1487_v10 = vpack.c.bf16 %v48_v9, %v47_v8  ;;  %v50_v12 = vld [vmem:[#allocation5 + $0x38] sm:$0xff]  ;;  %v51_v14 = vld [vmem:[#allocation5 + $0x40] sm:$0xff]  ;;  %v52_v15 = vld [vmem:[#allocation5 + $0x48] sm:$0xff]  ;;  %s1361_s13 = scalar_lea.vmem %s658_s10, 256  ;;  %p1366_p3 = scmp.lt.s32.totalorder %s658_s10, %s658_s10 }
  0x2b   :  { %1102 = vmatpush3.bf16.msra.mxu0 %v1478_v5  ;;  %1126 = vmatpush3.bf16.msra.mxu1 %v1478_v5  ;;  %v1493_v13 = vpack.c.bf16 %v50_v12, %v49_v11  ;;  %v1499_v16 = vpack.c.bf16 %v52_v15, %v51_v14  ;;  %v53_v17 = vld [vmem:[#allocation5 + $0x50] sm:$0xff]  ;;  %v54_v18 = vld [vmem:[#allocation5 + $0x58] sm:$0xff]  ;;  %v55_v20 = vld [vmem:[#allocation5 + $0x60] sm:$0xff]  ;;  %p1362_p2 = scmp.ne.s32.totalorder %s658_s10, %s1361_s13  ;;  %p1367_p4 = scmp.lt.s32.totalorder %s1361_s13, %s1361_s13 }
  0x2c   :  { %1103 = vmatprep.subr.bf16.mxu0 %v1417_v0  ;;  %1127 = vmatprep.subr.bf16.mxu1 %v1417_v0  ;;  %v1505_v19 = vpack.c.bf16 %v54_v18, %v53_v17  ;;  %v56_v21 = vld [vmem:[#allocation5 + $0x68] sm:$0xff]  ;;  %v57_v23 = vld [vmem:[#allocation5 + $0x70] sm:$0xff]  ;;  %v58_v24 = vld [vmem:[#allocation5 + $0x78] sm:$0xff] }
  0x2d   :  { %v1511_v22 = vpack.c.bf16 %v56_v21, %v55_v20  ;;  %v1517_v25 = vpack.c.bf16 %v58_v24, %v57_v23  ;;  %v59_v26 = vld [vmem:[#allocation2] sm:$0x3]  ;;  %v133_v31 = vld [vmem:[#allocation2 + $0x2] sm:$0x3]  ;;  %v207_v36 = vld [vmem:[#allocation2 + $0x4] sm:$0x3]  ;;  %p1368_p5 = por %p1367_p4, %p1366_p3 }
  0x2e   :  { %v281_v41 = vld [vmem:[#allocation2 + $0x6] sm:$0x3]  ;;  %v355_v46 = vld [vmem:[#allocation2 + $0x8] sm:$0x3]  ;;  %v429_v51 = vld [vmem:[#allocation2 + $0xa] sm:$0x3] }
  0x2f   :  { %1105 = vmatpush3.bf16.msra.mxu0 %v1481_v7  ;;  %1129 = vmatpush3.bf16.msra.mxu1 %v1481_v7  ;;  %v503_v56 = vld [vmem:[#allocation2 + $0xc] sm:$0x3]  ;;  %v577_v61 = vld [vmem:[#allocation2 + $0xe] sm:$0x3]  ;;  %p1369_p6 = pnand %p1368_p5, %p1362_p2 }
  0x30   :  { %1106 = vmatprep.subr.bf16.mxu0 %v1417_v0  ;;  %1130 = vmatprep.subr.bf16.mxu1 %v1417_v0 }
  0x33   :  { %1108 = vmatpush3.bf16.msra.mxu0 %v1487_v10  ;;  %1132 = vmatpush3.bf16.msra.mxu1 %v1487_v10 }
  0x34   :  { %1109 = vmatprep.subr.bf16.mxu0 %v1417_v0  ;;  %1133 = vmatprep.subr.bf16.mxu1 %v1417_v0 }
  0x37   :  { %1111 = vmatpush3.bf16.msra.mxu0 %v1493_v13  ;;  %1135 = vmatpush3.bf16.msra.mxu1 %v1493_v13 }
  0x38   :  { %1112 = vmatprep.subr.bf16.mxu0 %v1417_v0  ;;  %1136 = vmatprep.subr.bf16.mxu1 %v1417_v0 }
  0x3b   :  { %1114 = vmatpush3.bf16.msra.mxu0 %v1499_v16  ;;  %1138 = vmatpush3.bf16.msra.mxu1 %v1499_v16 }
  0x3c   :  { %1115 = vmatprep.subr.bf16.mxu0 %v1417_v0  ;;  %1139 = vmatprep.subr.bf16.mxu1 %v1417_v0 }
  0x3f   :  { %1117 = vmatpush3.bf16.msra.mxu0 %v1505_v19  ;;  %1141 = vmatpush3.bf16.msra.mxu1 %v1505_v19 }
  0x40   :  { %1118 = vmatprep.subr.bf16.mxu0 %v1417_v0  ;;  %1142 = vmatprep.subr.bf16.mxu1 %v1417_v0 }
  0x43   :  { %1120 = vmatpush3.bf16.msra.mxu0 %v1511_v22  ;;  %1144 = vmatpush3.bf16.msra.mxu1 %v1511_v22 }
  0x44   :  { %1121 = vmatprep.subr.bf16.mxu0 %v1417_v0  ;;  %1145 = vmatprep.subr.bf16.mxu1 %v1417_v0 }
  0x47   :  { %1123 = vmatpush3.bf16.msra.mxu0 %v1517_v25  ;;  %1147 = vmatpush3.bf16.msra.mxu1 %v1517_v25 }
  0x48   :  { %1148 = vmatprep.subr.bf16.mxu0 %v1417_v0  ;;  %1172 = vmatprep.subr.bf16.mxu1 %v1417_v0 }
  0x4a   :  { %853 = vmatmul.mubr.f32.vlgmr.msra.gmra.mrb[0].mxu0 %v1419_v1 }
  0x4b   :  { %1150 = vmatpush3.bf16.msra.mxu0 %v1478_v5  ;;  %922 = vmatprep.mubr.msk.f32.mxu0 %vm1418_vm0, %v1419_v1 }
  0x4c   :  { %1151 = vmatprep.subr.bf16.mxu0 %v1417_v0 }
  0x4f   :  { %1153 = vmatpush3.bf16.msra.mxu0 %v1481_v7 }
  0x50   :  { %1154 = vmatprep.subr.bf16.mxu0 %v1417_v0 }
  0x53   :  { %1156 = vmatpush3.bf16.msra.mxu0 %v1487_v10 }
  0x54   :  { %1157 = vmatprep.subr.bf16.mxu0 %v1417_v0 }
  0x57   :  { %1159 = vmatpush3.bf16.msra.mxu0 %v1493_v13 }
  0x58   :  { %1160 = vmatprep.subr.bf16.mxu0 %v1417_v0 }
  0x5b   :  { %1162 = vmatpush3.bf16.msra.mxu0 %v1499_v16 }
  0x5c   :  { %1163 = vmatprep.subr.bf16.mxu0 %v1417_v0 }
  0x5f   :  { %1165 = vmatpush3.bf16.msra.mxu0 %v1505_v19 }
  0x60   :  { %1166 = vmatprep.subr.bf16.mxu0 %v1417_v0 }
  0x63   :  { %1168 = vmatpush3.bf16.msra.mxu0 %v1511_v22 }
  0x64   :  { %1169 = vmatprep.subr.bf16.mxu0 %v1417_v0 }
  0x67   :  { %1171 = vmatpush3.bf16.msra.mxu0 %v1517_v25 }
  0x68   :  { %1196 = vmatprep.subr.bf16.mxu0 %v1417_v0 }
 0x11d   :  { %v126_v27 = vpop.f32.mrb[0].mxu0 }
 0x11e   :  { %v130_v28 = vadd.f32 %v126_v27, %v59_v26  ;;  %v854_v29 = vpop.f32.mrb[1].mxu0 }
 0x120   :  { %1301 = vtanh.f32 %v130_v28 }
 0x12a   :  { %v1302_v30 = vpop.eup %1301 }
 0x12b   :  { %132 = vst [vmem:[#allocation7] sm:$0x3] %v1302_v30  ;;  %888 = vmatmul.mubr.f32.vlgmr.msra.gmra.mrb[0].mxu1 %v1302_v30 }
 0x12c   :  { %1174 = vmatpush3.bf16.msra.mxu1 %v1478_v5  ;;  %957 = vmatprep.mubr.msk.f32.mxu1 %vm1418_vm0, %v1419_v1 }
 0x12d   :  { %1175 = vmatprep.subr.bf16.mxu1 %v1417_v0 }
 0x130   :  { %1177 = vmatpush3.bf16.msra.mxu1 %v1481_v7 }
 0x131   :  { %1178 = vmatprep.subr.bf16.mxu1 %v1417_v0 }
 0x134   :  { %1180 = vmatpush3.bf16.msra.mxu1 %v1487_v10 }
 0x135   :  { %1181 = vmatprep.subr.bf16.mxu1 %v1417_v0 }
 0x138   :  { %1183 = vmatpush3.bf16.msra.mxu1 %v1493_v13 }
 0x139   :  { %1184 = vmatprep.subr.bf16.mxu1 %v1417_v0 }
 0x13c   :  { %1186 = vmatpush3.bf16.msra.mxu1 %v1499_v16 }
 0x13d   :  { %1187 = vmatprep.subr.bf16.mxu1 %v1417_v0 }
 0x140   :  { %1189 = vmatpush3.bf16.msra.mxu1 %v1505_v19 }
 0x141   :  { %1190 = vmatprep.subr.bf16.mxu1 %v1417_v0 }
 0x144   :  { %1192 = vmatpush3.bf16.msra.mxu1 %v1511_v22 }
 0x145   :  { %1193 = vmatprep.subr.bf16.mxu1 %v1417_v0 }
 0x148   :  { %1195 = vmatpush3.bf16.msra.mxu1 %v1517_v25 }
 0x149   :  { %1220 = vmatprep.subr.bf16.mxu1 %v1417_v0 }
 0x1fe   :  { %v200_v32 = vpop.f32.mrb[0].mxu1 }
 0x1ff   :  { %v204_v33 = vadd.f32 %v200_v32, %v133_v31  ;;  %v889_v34 = vpop.f32.mrb[1].mxu1 }
 0x201   :  { %1303 = vtanh.f32 %v204_v33 }
 0x20b   :  { %v1304_v35 = vpop.eup %1303 }
 0x20c   :  { %206 = vst [vmem:[#allocation7 + $0x2] sm:$0x3] %v1304_v35  ;;  %923 = vmatmul.mubr.f32.vlgmr.msra.gmra.mrb[2].mxu0 %v1304_v35 }
 0x20d   :  { %1198 = vmatpush3.bf16.msra.mxu0 %v1478_v5  ;;  %992 = vmatprep.mubr.msk.f32.mxu0 %vm1418_vm0, %v1419_v1 }
 0x20e   :  { %1199 = vmatprep.subr.bf16.mxu0 %v1417_v0 }
 0x211   :  { %1201 = vmatpush3.bf16.msra.mxu0 %v1481_v7 }
 0x212   :  { %1202 = vmatprep.subr.bf16.mxu0 %v1417_v0 }
 0x215   :  { %1204 = vmatpush3.bf16.msra.mxu0 %v1487_v10 }
 0x216   :  { %1205 = vmatprep.subr.bf16.mxu0 %v1417_v0 }
 0x219   :  { %1207 = vmatpush3.bf16.msra.mxu0 %v1493_v13 }
 0x21a   :  { %1208 = vmatprep.subr.bf16.mxu0 %v1417_v0 }
 0x21d   :  { %1210 = vmatpush3.bf16.msra.mxu0 %v1499_v16 }
 0x21e   :  { %1211 = vmatprep.subr.bf16.mxu0 %v1417_v0 }
 0x221   :  { %1213 = vmatpush3.bf16.msra.mxu0 %v1505_v19 }
 0x222   :  { %1214 = vmatprep.subr.bf16.mxu0 %v1417_v0 }
 0x225   :  { %1216 = vmatpush3.bf16.msra.mxu0 %v1511_v22 }
 0x226   :  { %1217 = vmatprep.subr.bf16.mxu0 %v1417_v0 }
 0x229   :  { %1219 = vmatpush3.bf16.msra.mxu0 %v1517_v25 }
 0x22a   :  { %1244 = vmatprep.subr.bf16.mxu0 %v1417_v0 }
 0x2df   :  { %v274_v37 = vpop.f32.mrb[2].mxu0 }
 0x2e0   :  { %v278_v38 = vadd.f32 %v274_v37, %v207_v36  ;;  %v924_v39 = vpop.f32.mrb[3].mxu0 }
 0x2e2   :  { %1305 = vtanh.f32 %v278_v38 }
 0x2ec   :  { %v1306_v40 = vpop.eup %1305 }
 0x2ed   :  { %280 = vst [vmem:[#allocation7 + $0x4] sm:$0x3] %v1306_v40  ;;  %958 = vmatmul.mubr.f32.vlgmr.msra.gmra.mrb[2].mxu1 %v1306_v40 }
 0x2ee   :  { %1222 = vmatpush3.bf16.msra.mxu1 %v1478_v5  ;;  %1027 = vmatprep.mubr.msk.f32.mxu1 %vm1418_vm0, %v1419_v1 }
 0x2ef   :  { %1223 = vmatprep.subr.bf16.mxu1 %v1417_v0 }
 0x2f2   :  { %1225 = vmatpush3.bf16.msra.mxu1 %v1481_v7 }
 0x2f3   :  { %1226 = vmatprep.subr.bf16.mxu1 %v1417_v0 }
 0x2f6   :  { %1228 = vmatpush3.bf16.msra.mxu1 %v1487_v10 }
 0x2f7   :  { %1229 = vmatprep.subr.bf16.mxu1 %v1417_v0 }
 0x2fa   :  { %1231 = vmatpush3.bf16.msra.mxu1 %v1493_v13 }
 0x2fb   :  { %1232 = vmatprep.subr.bf16.mxu1 %v1417_v0 }
 0x2fe   :  { %1234 = vmatpush3.bf16.msra.mxu1 %v1499_v16 }
 0x2ff   :  { %1235 = vmatprep.subr.bf16.mxu1 %v1417_v0 }
 0x302   :  { %1237 = vmatpush3.bf16.msra.mxu1 %v1505_v19 }
 0x303   :  { %1238 = vmatprep.subr.bf16.mxu1 %v1417_v0 }
 0x306   :  { %1240 = vmatpush3.bf16.msra.mxu1 %v1511_v22 }
 0x307   :  { %1241 = vmatprep.subr.bf16.mxu1 %v1417_v0 }
 0x30a   :  { %1243 = vmatpush3.bf16.msra.mxu1 %v1517_v25 }
 0x30b   :  { %1268 = vmatprep.subr.bf16.mxu1 %v1417_v0 }
 0x3c0   :  { %v348_v42 = vpop.f32.mrb[2].mxu1 }
 0x3c1   :  { %v352_v43 = vadd.f32 %v348_v42, %v281_v41  ;;  %v959_v44 = vpop.f32.mrb[3].mxu1 }
 0x3c3   :  { %1307 = vtanh.f32 %v352_v43 }
 0x3cd   :  { %v1308_v45 = vpop.eup %1307 }
 0x3ce   :  { %354 = vst [vmem:[#allocation7 + $0x6] sm:$0x3] %v1308_v45  ;;  %993 = vmatmul.mubr.f32.vlgmr.msra.gmra.mrb[4].mxu0 %v1308_v45 }
 0x3cf   :  { %1246 = vmatpush3.bf16.msra.mxu0 %v1478_v5  ;;  %1062 = vmatprep.mubr.msk.f32.mxu0 %vm1418_vm0, %v1419_v1 }
 0x3d0   :  { %1247 = vmatprep.subr.bf16.mxu0 %v1417_v0 }
 0x3d3   :  { %1249 = vmatpush3.bf16.msra.mxu0 %v1481_v7 }
 0x3d4   :  { %1250 = vmatprep.subr.bf16.mxu0 %v1417_v0 }
 0x3d7   :  { %1252 = vmatpush3.bf16.msra.mxu0 %v1487_v10 }
 0x3d8   :  { %1253 = vmatprep.subr.bf16.mxu0 %v1417_v0 }
 0x3db   :  { %1255 = vmatpush3.bf16.msra.mxu0 %v1493_v13 }
 0x3dc   :  { %1256 = vmatprep.subr.bf16.mxu0 %v1417_v0 }
 0x3df   :  { %1258 = vmatpush3.bf16.msra.mxu0 %v1499_v16 }
 0x3e0   :  { %1259 = vmatprep.subr.bf16.mxu0 %v1417_v0 }
 0x3e3   :  { %1261 = vmatpush3.bf16.msra.mxu0 %v1505_v19 }
 0x3e4   :  { %1262 = vmatprep.subr.bf16.mxu0 %v1417_v0 }
 0x3e7   :  { %1264 = vmatpush3.bf16.msra.mxu0 %v1511_v22 }
 0x3e8   :  { %1265 = vmatprep.subr.bf16.mxu0 %v1417_v0 }
 0x3eb   :  { %1267 = vmatpush3.bf16.msra.mxu0 %v1517_v25 }
 0x4a1   :  { %v422_v47 = vpop.f32.mrb[4].mxu0 }
 0x4a2   :  { %v426_v48 = vadd.f32 %v422_v47, %v355_v46  ;;  %v994_v49 = vpop.f32.mrb[5].mxu0 }
 0x4a4   :  { %1309 = vtanh.f32 %v426_v48 }
 0x4ae   :  { %v1310_v50 = vpop.eup %1309 }
 0x4af   :  { %428 = vst [vmem:[#allocation7 + $0x8] sm:$0x3] %v1310_v50  ;;  %1028 = vmatmul.mubr.f32.vlgmr.msra.gmra.mrb[4].mxu1 %v1310_v50 }
 0x4b0   :  { %1270 = vmatpush3.bf16.msra.mxu1 %v1478_v5  ;;  %1097 = vmatprep.mubr.msk.f32.mxu1 %vm1418_vm0, %v1419_v1 }
 0x4b1   :  { %1271 = vmatprep.subr.bf16.mxu1 %v1417_v0 }
 0x4b4   :  { %1273 = vmatpush3.bf16.msra.mxu1 %v1481_v7 }
 0x4b5   :  { %1274 = vmatprep.subr.bf16.mxu1 %v1417_v0 }
 0x4b8   :  { %1276 = vmatpush3.bf16.msra.mxu1 %v1487_v10 }
 0x4b9   :  { %1277 = vmatprep.subr.bf16.mxu1 %v1417_v0 }
 0x4bc   :  { %1279 = vmatpush3.bf16.msra.mxu1 %v1493_v13 }
 0x4bd   :  { %1280 = vmatprep.subr.bf16.mxu1 %v1417_v0 }
 0x4c0   :  { %1282 = vmatpush3.bf16.msra.mxu1 %v1499_v16 }
 0x4c1   :  { %1283 = vmatprep.subr.bf16.mxu1 %v1417_v0 }
 0x4c4   :  { %1285 = vmatpush3.bf16.msra.mxu1 %v1505_v19 }
 0x4c5   :  { %1286 = vmatprep.subr.bf16.mxu1 %v1417_v0 }
 0x4c8   :  { %1288 = vmatpush3.bf16.msra.mxu1 %v1511_v22 }
 0x4c9   :  { %1289 = vmatprep.subr.bf16.mxu1 %v1417_v0 }
 0x4cc   :  { %1291 = vmatpush3.bf16.msra.mxu1 %v1517_v25 }
 0x582   :  { %v496_v52 = vpop.f32.mrb[4].mxu1 }
 0x583   :  { %v500_v53 = vadd.f32 %v496_v52, %v429_v51  ;;  %v1029_v54 = vpop.f32.mrb[5].mxu1 }
 0x585   :  { %1311 = vtanh.f32 %v500_v53 }
 0x58f   :  { %v1312_v55 = vpop.eup %1311 }
 0x590   :  { %502 = vst [vmem:[#allocation7 + $0xa] sm:$0x3] %v1312_v55  ;;  %1063 = vmatmul.mubr.f32.vlgmr.msra.gmra.mrb[6].mxu0 %v1312_v55 }
 0x663   :  { %v570_v57 = vpop.f32.mrb[6].mxu0 }
 0x664   :  { %v574_v58 = vadd.f32 %v570_v57, %v503_v56  ;;  %v1064_v59 = vpop.f32.mrb[7].mxu0 }
 0x666   :  { %1313 = vtanh.f32 %v574_v58 }
 0x670   :  { %v1314_v60 = vpop.eup %1313 }
 0x671   :  { %576 = vst [vmem:[#allocation7 + $0xc] sm:$0x3] %v1314_v60  ;;  %1098 = vmatmul.mubr.f32.vlgmr.msra.gmra.mrb[6].mxu1 %v1314_v60 }
 0x744   :  { %v644_v62 = vpop.f32.mrb[6].mxu1 }
 0x745   :  { %v648_v63 = vadd.f32 %v644_v62, %v577_v61  ;;  %v1099_v0 = vpop.f32.mrb[7].mxu1 }
 0x747   :  { %1315 = vtanh.f32 %v648_v63 }
 0x751   :  { %v1316_v1 = vpop.eup %1315 }
 0x752   :  { %650 = vst [vmem:[#allocation7 + $0xe] sm:$0x3] %v1316_v1  ;;  %651 = vst [vmem:[#allocation8] sm:$0x3] %v1316_v1 }
 0x753   :  { %1372 = shalt.err (!%p1369_p6)
}
 0x754   :  { %s1373_s16 = scalar_lea.hbm %s1662_s2, 256 }
 0x755   :  { %p1374_p7 = scmp.ne.s32.totalorder %s1662_s2, %s1373_s16  ;;  %p1377_p8 = scmp.lt.u32.totalorder %s1373_s16, %s1662_s2 }
 0x757   :  { %p1379_p9 = pnand %p1377_p8, %p1374_p7 }
 0x759   :  { %1382 = shalt.err (!%p1379_p9)
}
 0x75a   :  { %663 = dma.vmem_to_hbm [thread:$0]  %s658_s10, 256, %s1662_s2, [#allocation4], %s1414_s22, %s1414_s22, %s1415_s23  }
 0x75b   :  { %s1383_s25 = scalar_lea.vmem %s671_s12, 32  ;;  %p1388_p11 = scmp.lt.s32.totalorder %s671_s12, %s671_s12 }
 0x75c   :  { %p1384_p10 = scmp.ne.s32.totalorder %s671_s12, %s1383_s25  ;;  %p1389_p12 = scmp.lt.s32.totalorder %s1383_s25, %s1383_s25 }
 0x75e   :  { %p1390_p13 = por %p1389_p12, %p1388_p11 }
 0x760   :  { %p1391_p0 = pnand %p1390_p13, %p1384_p10 }
 0x762   :  { %1394 = shalt.err (!%p1391_p0)
}
 0x763   :  { %s1395_s28 = scalar_lea.hbm %s1663_s3, 32 }
 0x764   :  { %p1396_p1 = scmp.ne.s32.totalorder %s1663_s3, %s1395_s28  ;;  %p1399_p2 = scmp.lt.u32.totalorder %s1395_s28, %s1663_s3 }
 0x766   :  { %p1401_p3 = pnand %p1399_p2, %p1396_p1 }
 0x768   :  { %1404 = shalt.err (!%p1401_p3)
}
 0x769   :  { %673 = dma.vmem_to_hbm [thread:$0]  %s671_s12, 32, %s1663_s3, [#allocation9]  }
 0x76a   :  { %1409 = dma.done.wait [#allocation4], 256  }
 0x76b   :  { %1410 = vsyncadd [#allocation4], 4294967040 }
 0x76c   :  { %1411 = dma.done.wait [#allocation9], 32  }
 0x76d   :  { %1412 = vsyncadd [#allocation9], 4294967264 }
 0x76e   :  { %680 = vsyncpa [#allocation3], 1 }
 0x76f   :  { %681 = vsyncpa [#allocation6], 1 }
 0x770   :  { %682 = vsyncpa [#allocation4], 1 }
 0x771   :  { %683 = vsyncpa [#allocation9], 1 }

</bundles_post_ra>
